<compile_context>
chip_gen: v7x
topology: tpu7x:2x2x1
jax: 0.10.0
libtpu: 0.0.40
codegen_flags: <defaults>
</compile_context>

<pallas_src>
from functools import partial

import numpy as np
import jax
import jax.numpy as jnp
from jax.experimental import pallas as pl
from jax.experimental.pallas import tpu as pltpu


def _round_up(n, m):
    return ((n + m - 1) // m) * m


def cnn_layer_kernel(x_ref, m_ref, wt_ref, b_ref, o_ref, *, c_out_pad):
    # x_ref : (TB, L*C_in)                lane-dense flattened activations
    # m_ref : (TB, L*C_in)                lane-dense mask (repeated over C_in)
    # wt_ref: (L*C_in, L_out_pad*C_out_pad)  block-Toeplitz conv weight
    # b_ref : (1, 128)                    bias tiled across the 128 lanes
    # o_ref : (TB, 128)                   lane-dense output (result replicated per
    #                                     C_out_pad-lane group; wrapper slices)
    xm = x_ref[...] * m_ref[...]
    # One MXU matmul does the whole Conv1d for every sequence in the block.
    acc = jnp.dot(xm, wt_ref[...], preferred_element_type=jnp.float32)  # (TB, N) f32

    # Global max over conv positions, done entirely with vreg-aligned lane ops so
    # the result stays 128 lanes wide (no (TB, L_out, C_out) relayout, dense store).
    n = acc.shape[1]                       # multiple of 128 by construction
    m = acc[:, :128]
    for t in range(1, n // 128):           # fold the N/128 lane-tiles (aligned slices)
        m = jnp.maximum(m, acc[:, t * 128:(t + 1) * 128])
    shift = 64                             # tree-reduce the 128//C_out_pad groups
    while shift >= c_out_pad:              # per 128-lane tile via XLU rotations
        m = jnp.maximum(m, pltpu.roll(m, shift=shift, axis=1))
        shift //= 2
    # Every lane j now holds max over all positions for channel j % C_out_pad.
    o_ref[...] = jnp.tanh(m + b_ref[...])


def _build_toeplitz_weight(w, L, pad, L_out_pad, C_out_pad):
    """(K, C_in, C_out) conv weight -> (L*C_in, L_out_pad*C_out_pad) block-Toeplitz.

    Column (lo*C_out_pad + co) of the result, dotted with the flattened masked
    sequence (row index i*C_in + ci), equals the Conv1d output at position lo,
    channel co (zero padding handled by simply omitting out-of-range rows).
    Positions lo >= L_out duplicate position 0 (max-invariant); channels
    co >= C_out are zero (sliced off by the wrapper).
    """
    K, C_in, C_out = w.shape
    L_out = L + 2 * pad - K + 1
    i_idx = jnp.arange(L)
    lo_idx = jnp.arange(L_out)
    wt4 = jnp.zeros((L, C_in, L_out, C_out_pad), jnp.float32)
    for k in range(K):
        sel = (i_idx[:, None] == (lo_idx[None, :] - pad + k)).astype(jnp.float32)  # (L, L_out)
        wk = jnp.pad(w[k].astype(jnp.float32), ((0, 0), (0, C_out_pad - C_out)))   # (C_in, C_out_pad)
        wt4 = wt4 + sel[:, None, :, None] * wk[None, :, None, :]
    if L_out_pad > L_out:  # pad positions by duplicating position 0 (doesn't change the max)
        dup = jnp.broadcast_to(wt4[:, :, 0:1, :], (L, C_in, L_out_pad - L_out, C_out_pad))
        wt4 = jnp.concatenate([wt4, dup], axis=2)
    return wt4.reshape(L * C_in, L_out_pad * C_out_pad)


def cnn_layer(x, mask, w, bias, *, padding=1, batch_block=None, mxu_dtype=jnp.float32):
    """x: (B, L, C_in), mask: (B, L), w: (K, C_in, C_out), bias: (C_out,) -> (B, C_out)."""
    B, L, C_in = x.shape
    K, _, C_out = w.shape
    assert C_out <= 128, "num_filter > 128 not supported by this kernel"
    L_out = L + 2 * padding - K + 1
    LC = L * C_in

    # Lane padding: C_out -> next power of two (zero channels, sliced off later),
    # L_out -> multiple of groups-per-vreg so the matmul output is a whole number
    # of 128-lane tiles.
    C_out_pad = pl.next_power_of_2(C_out)
    g = 128 // C_out_pad
    L_out_pad = _round_up(L_out, g)
    N = L_out_pad * C_out_pad

    # Batch tiling: one grid step for small batches (v5e/v6e have 1 TC; extra steps
    # are pure per-step overhead).  For big batches, TB<=512 and an even number of
    # blocks so both v7x TensorCores get work on the "parallel" axis.
    if batch_block is None:
        batch_block = min(B, 512)
    TB = _round_up(min(int(batch_block), B), 8)
    nb = pl.cdiv(B, TB)
    if nb > 1 and nb % 2 == 1:
        nb += 1
    B_pad = nb * TB

    xf = x.astype(jnp.float32)
    mf = mask.astype(jnp.float32)
    if B_pad != B:  # padded rows are independent; reduced to tanh(bias) and sliced off
        xf = jnp.pad(xf, ((0, B_pad - B), (0, 0), (0, 0)))
        mf = jnp.pad(mf, ((0, B_pad - B), (0, 0)))

    x_flat = xf.reshape(B_pad, LC).astype(mxu_dtype)              # (B_pad, L*C_in)
    m_flat = jnp.repeat(mf, C_in, axis=1).astype(mxu_dtype)       # (B_pad, L*C_in)
    wt = _build_toeplitz_weight(w, L, padding, L_out_pad, C_out_pad).astype(mxu_dtype)
    b_tiled = jnp.tile(jnp.pad(bias.astype(jnp.float32), (0, C_out_pad - C_out)),
                       g).reshape(1, 128)

    kernel = partial(cnn_layer_kernel, c_out_pad=C_out_pad)

    out = pl.pallas_call(
        kernel,
        out_shape=jax.ShapeDtypeStruct((B_pad, 128), jnp.float32),
        grid_spec=pltpu.PrefetchScalarGridSpec(
            num_scalar_prefetch=0,
            grid=(nb,),
            in_specs=[
                pl.BlockSpec((TB, LC), lambda b: (b, 0)),       # activations
                pl.BlockSpec((TB, LC), lambda b: (b, 0)),       # mask (lane-dense)
                pl.BlockSpec((LC, N), lambda b: (0, 0)),        # Toeplitz weight (constant)
                pl.BlockSpec((1, 128), lambda b: (0, 0)),       # tiled bias (constant)
            ],
            out_specs=pl.BlockSpec((TB, 128), lambda b: (b, 0)),
        ),
        compiler_params=pltpu.CompilerParams(dimension_semantics=("parallel",)),
    )(x_flat, m_flat, wt, b_tiled)

    return out[:B, :C_out]


def cnn_layer_ref(x, mask, w, bias, *, padding=1):
    """Pure-JAX reference matching the PyTorch forward."""
    xm = x * mask[..., None]
    xp = jnp.pad(xm, ((0, 0), (padding, padding), (0, 0)))
    K, _, C_out = w.shape
    L_out = x.shape[1] + 2 * padding - K + 1
    acc = jnp.zeros((x.shape[0], L_out, C_out), jnp.float32)
    for k in range(K):
        acc += jnp.einsum("blc,cf->blf", xp[:, k:k + L_out, :], w[k])
    acc = acc + bias[None, None, :]
    return jnp.tanh(jnp.max(acc, axis=1))


if __name__ == "__main__":
    # CNN_Layer(input_dim=8, num_filter=16, kernel_size=3); small batch/seq.
    L, C_in, C_out, K = 16, 8, 16, 3

    key = jax.random.PRNGKey(0)
    kx, km, kw, kb = jax.random.split(key, 4)

    # Deterministic "parameters" (Conv1d weight (C_out, C_in, K) stored as (K, C_in, C_out))
    bound = 1.0 / np.sqrt(C_in * K)
    w = jax.random.uniform(kw, (K, C_in, C_out), minval=-bound, maxval=bound,
                           dtype=jnp.float32)
    bias = jax.random.uniform(kb, (C_out,), minval=-bound, maxval=bound,
                              dtype=jnp.float32)

    configs = [
        # B=8 : single grid step (small batch).       f32 MXU path, tight tolerance.
        dict(B=8, batch_block=None, mxu_dtype=jnp.float32, tol=1e-5),
        # B=5 : exercises zero-padded batch rows.
        dict(B=5, batch_block=None, mxu_dtype=jnp.float32, tol=1e-5),
        # B=48, TB=16 : multi-block grid (block count rounded up to even for v7x).
        dict(B=48, batch_block=16, mxu_dtype=jnp.float32, tol=1e-5),
        # bf16 MXU-operand path recommended for v6e/v7x (f32 accumulate + epilogue).
        dict(B=8, batch_block=None, mxu_dtype=jnp.bfloat16, tol=2e-2),
    ]

    for cfg in configs:
        B = cfg["B"]
        kxb = jax.random.fold_in(kx, B)
        kmb = jax.random.fold_in(km, B)
        x = jax.random.normal(kxb, (B, L, C_in), dtype=jnp.float32)
        mask = jax.random.bernoulli(kmb, p=0.7, shape=(B, L)).astype(jnp.float32)

        out = jax.block_until_ready(
            cnn_layer(x, mask, w, bias, padding=1,
                      batch_block=cfg["batch_block"], mxu_dtype=cfg["mxu_dtype"]))
        ref = jax.block_until_ready(cnn_layer_ref(x, mask, w, bias, padding=1))

        assert out.shape == (B, C_out), out.shape
        np.testing.assert_allclose(np.asarray(out), np.asarray(ref),
                                   rtol=cfg["tol"], atol=cfg["tol"])

    print("KERNEL_OK")
</pallas_src>

<mosaic_0001>
module attributes {stable_mosaic.version = 11 : i64} {
  func.func @cnn_layer_kernel(%arg0: i32, %arg1: memref<8x128xf32, #tpu.memory_space<vmem>>, %arg2: memref<8x128xf32, #tpu.memory_space<vmem>>, %arg3: memref<128x256xf32, #tpu.memory_space<vmem>>, %arg4: memref<1x128xf32, #tpu.memory_space<vmem>>, %arg5: memref<8x128xf32, #tpu.memory_space<vmem>>) attributes {dimension_semantics = [#tpu.dimension_semantics<parallel>], iteration_bounds = array<i64: 1>, scalar_prefetch = 0 : i64, scratch_operands = 0 : i64, tpu.core_type = #tpu.core_type<tc>, window_params = [{transform_indices = @transform_0, window_bounds = array<i64: 8, 128>}, {transform_indices = @transform_1, window_bounds = array<i64: 8, 128>}, {pipeline_mode = #tpu.pipeline_mode<synchronous>, transform_indices = @transform_2, window_bounds = array<i64: 128, 256>}, {pipeline_mode = #tpu.pipeline_mode<synchronous>, transform_indices = @transform_3, window_bounds = array<i64: 1, 128>}, {transform_indices = @transform_4, window_bounds = array<i64: 8, 128>}]} {
    %c0 = arith.constant 0 : index
    %c0_0 = arith.constant 0 : index
    %0 = vector.load %arg1[%c0, %c0_0] : memref<8x128xf32, #tpu.memory_space<vmem>>, vector<8x128xf32>
    %c0_1 = arith.constant 0 : index
    %c0_2 = arith.constant 0 : index
    %1 = vector.load %arg2[%c0_1, %c0_2] : memref<8x128xf32, #tpu.memory_space<vmem>>, vector<8x128xf32>
    %2 = arith.mulf %0, %1 : vector<8x128xf32>
    %c0_3 = arith.constant 0 : index
    %c0_4 = arith.constant 0 : index
    %3 = vector.load %arg3[%c0_3, %c0_4] : memref<128x256xf32, #tpu.memory_space<vmem>>, vector<128x256xf32>
    %cst = arith.constant dense<0.000000e+00> : vector<8x256xf32>
    %4 = tpu.matmul %2, %3, %cst {dimension_numbers = #tpu.dot_dimension_numbers<[1], [0], [0], [1], [0, 0, 1, 1], [], []>} : vector<8x128xf32>, vector<128x256xf32>, vector<8x256xf32> -> vector<8x256xf32>
    %5 = vector.extract_strided_slice %4 {offsets = [0, 0], sizes = [8, 128], strides = [1, 1]} : vector<8x256xf32> to vector<8x128xf32>
    %6 = vector.extract_strided_slice %4 {offsets = [0, 128], sizes = [8, 128], strides = [1, 1]} : vector<8x256xf32> to vector<8x128xf32>
    %7 = arith.maximumf %5, %6 : vector<8x128xf32>
    %c64_i32 = arith.constant 64 : i32
    %8 = tpu.dynamic_rotate %7 by %c64_i32 dim 1 : vector<8x128xf32>, i32 -> vector<8x128xf32>
    %9 = arith.maximumf %7, %8 : vector<8x128xf32>
    %c32_i32 = arith.constant 32 : i32
    %10 = tpu.dynamic_rotate %9 by %c32_i32 dim 1 : vector<8x128xf32>, i32 -> vector<8x128xf32>
    %11 = arith.maximumf %9, %10 : vector<8x128xf32>
    %c16_i32 = arith.constant 16 : i32
    %12 = tpu.dynamic_rotate %11 by %c16_i32 dim 1 : vector<8x128xf32>, i32 -> vector<8x128xf32>
    %13 = arith.maximumf %11, %12 : vector<8x128xf32>
    %c0_5 = arith.constant 0 : index
    %c0_6 = arith.constant 0 : index
    %14 = vector.load %arg4[%c0_5, %c0_6] : memref<1x128xf32, #tpu.memory_space<vmem>>, vector<1x128xf32>
    %15 = vector.broadcast %14 : vector<1x128xf32> to vector<8x128xf32>
    %16 = arith.addf %13, %15 : vector<8x128xf32>
    %17 = math.tanh %16 : vector<8x128xf32>
    %c0_7 = arith.constant 0 : index
    %c0_8 = arith.constant 0 : index
    %18 = vector.load %arg5[%c0_7, %c0_8] : memref<8x128xf32, #tpu.memory_space<vmem>>, vector<8x128xf32>
    tpu.vector_store %arg5[%c0_7, %c0_8], %17 {strides = array<i32>} : memref<8x128xf32, #tpu.memory_space<vmem>>, vector<8x128xf32>,
    return
  }
  func.func @transform_0(%arg0: i32) -> (i32, i32) {
    %c0_i32 = arith.constant 0 : i32
    %c0_i32_0 = arith.constant 0 : i32
    return %arg0, %c0_i32 : i32, i32
  }
  func.func @transform_1(%arg0: i32) -> (i32, i32) {
    %c0_i32 = arith.constant 0 : i32
    %c0_i32_0 = arith.constant 0 : i32
    return %arg0, %c0_i32 : i32, i32
  }
  func.func @transform_2(%arg0: i32) -> (i32, i32) {
    %c0_i32 = arith.constant 0 : i32
    %c0_i32_0 = arith.constant 0 : i32
    %c0_i32_1 = arith.constant 0 : i32
    return %c0_i32, %c0_i32_0 : i32, i32
  }
  func.func @transform_3(%arg0: i32) -> (i32, i32) {
    %c0_i32 = arith.constant 0 : i32
    %c0_i32_0 = arith.constant 0 : i32
    %c0_i32_1 = arith.constant 0 : i32
    return %c0_i32, %c0_i32_0 : i32, i32
  }
  func.func @transform_4(%arg0: i32) -> (i32, i32) {
    %c0_i32 = arith.constant 0 : i32
    %c0_i32_0 = arith.constant 0 : i32
    return %arg0, %c0_i32 : i32, i32
  }
}

</mosaic_0001>

<bundles_post_ra>
// kernel: tpu_custom_call.1
= control target key start
LH: loop header
LB: loop body
LE: loop exit
PB: predicated region body
PF: predicated region fallthrough
CT: control target
= control target key end

     0   :  { %9 = vsyncpa [#allocation3], 0  ;;  %s422_s0 = inlined_call_operand.hbm [shape: f32[8,128], index: 0, kind: input, shape index: {}]   ;;  %s423_s1 = inlined_call_operand.hbm [shape: f32[8,128], index: 1, kind: input, shape index: {}]   ;;  %s424_s2 = inlined_call_operand.hbm [shape: f32[128,256], index: 2, kind: input, shape index: {}]   ;;  %s425_s3 = inlined_call_operand.vmem [shape: f32[1,128], index: 3, kind: input, shape index: {}]   ;;  %s426_s4 = inlined_call_operand.hbm [shape: f32[8,128], index: 4, kind: output, shape index: {}]  }
   0x1   :  { %10 = vsyncpa [#allocation6], 0 }
   0x2   :  { %11 = vsyncpa [#allocation4], 0  ;;  %s335_s15 = smov [#allocation5]   ;;  %s336_s17 = smov [#allocation2]  }
   0x3   :  { %s28_s16 = sshll.u32 %s335_s15, 4  ;;  %s18_s18 = sshll.u32 %s336_s17, 4  ;;  %s29_s16 = int_to_ptr.vmem [resolvable:$true] %s28_s16  ;;  %s19_s18 = int_to_ptr.vmem [resolvable:$true] %s18_s18 }
   0x4   :  { %s241_s21 = scalar_lea.hbm %s423_s1, 128 }
   0x5   :  { %p242_p0 = scmp.ne.s32.totalorder %s423_s1, %s241_s21  ;;  %p245_p1 = scmp.lt.u32.totalorder %s241_s21, %s423_s1 }
   0x7   :  { %p247_p2 = pnand %p245_p1, %p242_p0 }
   0x9   :  { %250 = shalt.err (!%p247_p2)
}
   0xa   :  { %s251_s26 = scalar_lea.vmem %s29_s16, 128  ;;  %p256_p4 = scmp.lt.s32.totalorder %s29_s16, %s29_s16 }
   0xb   :  { %p252_p3 = scmp.ne.s32.totalorder %s29_s16, %s251_s26  ;;  %p257_p5 = scmp.lt.s32.totalorder %s251_s26, %s251_s26 }
   0xd   :  { %p258_p6 = por %p257_p5, %p256_p4 }
   0xf   :  { %p259_p7 = pnand %p258_p6, %p252_p3 }
  0x11   :  { %262 = shalt.err (!%p259_p7)
}
  0x12   :  { %31 = dma.hbm_to_vmem [thread:$0]  %s423_s1, 128, %s29_s16, [#allocation6]  }
  0x13   :  { %s263_s5 = scalar_lea.hbm %s422_s0, 128 }
  0x14   :  { %p264_p8 = scmp.ne.s32.totalorder %s422_s0, %s263_s5  ;;  %p267_p9 = scmp.lt.u32.totalorder %s263_s5, %s422_s0 }
  0x16   :  { %p269_p10 = pnand %p267_p9, %p264_p8 }
  0x18   :  { %272 = shalt.err (!%p269_p10)
}
  0x19   :  { %s273_s10 = scalar_lea.vmem %s19_s18, 128  ;;  %p278_p12 = scmp.lt.s32.totalorder %s19_s18, %s19_s18 }
  0x1a   :  { %p274_p11 = scmp.ne.s32.totalorder %s19_s18, %s273_s10  ;;  %p279_p13 = scmp.lt.s32.totalorder %s273_s10, %s273_s10 }
  0x1c   :  { %p280_p0 = por %p279_p13, %p278_p12 }
  0x1e   :  { %p281_p1 = pnand %p280_p0, %p274_p11 }
  0x20   :  { %284 = shalt.err (!%p281_p1)
}
  0x21   :  { %21 = dma.hbm_to_vmem [thread:$0]  %s422_s0, 128, %s19_s18, [#allocation3]  }
  0x22   :  { %s337_s12 = smov [#allocation7]   ;;  %s285_s16 = scalar_lea.hbm %s424_s2, 4096 }
  0x23   :  { %s37_s13 = sshll.u32 %s337_s12, 4  ;;  %p286_p2 = scmp.ne.s32.totalorder %s424_s2, %s285_s16  ;;  %s38_s13 = int_to_ptr.vmem [resolvable:$true] %s37_s13 }
  0x24   :  { %p289_p3 = scmp.lt.u32.totalorder %s285_s16, %s424_s2 }
  0x26   :  { %p291_p4 = pnand %p289_p3, %p286_p2 }
  0x28   :  { %294 = shalt.err (!%p291_p4)
}
  0x29   :  { %s295_s22 = scalar_lea.vmem %s38_s13, 4096  ;;  %p300_p6 = scmp.lt.s32.totalorder %s38_s13, %s38_s13 }
  0x2a   :  { %p296_p5 = scmp.ne.s32.totalorder %s38_s13, %s295_s22  ;;  %p301_p7 = scmp.lt.s32.totalorder %s295_s22, %s295_s22 }
  0x2c   :  { %p302_p8 = por %p301_p7, %p300_p6 }
  0x2e   :  { %p303_p9 = pnand %p302_p8, %p296_p5 }
  0x30   :  { %306 = shalt.err (!%p303_p9)
}
  0x31   :  { %s338_s0 = smov 256   ;;  %s339_s18 = smov 16  }
  0x32   :  { %43 = dma.hbm_to_vmem [thread:$0]  %s424_s2, 4096, %s38_s13, [#allocation6], %s338_s0, %s338_s0, %s339_s18  }
  0x33   :  { %329 = dma.done.wait [#allocation3], 128  }
  0x34   :  { %330 = vsyncadd [#allocation3], 4294967168 }
  0x35   :  { %331 = dma.done.wait [#allocation6], 4224  }
  0x36   :  { %332 = vsyncadd [#allocation6], 4294963072  ;;  %v340_v0 = vmov 0.0   ;;  %v59_v1 = vld [vmem:[#allocation7 + $0x8] sm:$0xff]  ;;  %v61_v2 = vld [vmem:[#allocation7 + $0x18] sm:$0xff]  ;;  %s341_s2 = smov 64  }
  0x37   :  { %154 = vmatprep.mubr.f32.mxu0 %v340_v0  ;;  %v58_v3 = vld [vmem:[#allocation7] sm:$0xff]  ;;  %v198_v4 = vpack.c.bf16 %v61_v2, %v59_v1  ;;  %v60_v5 = vld [vmem:[#allocation7 + $0x10] sm:$0xff]  ;;  %v63_v6 = vld [vmem:[#allocation7 + $0x28] sm:$0xff]  ;;  %s342_s25 = smov 32   ;;  %s343_s28 = smov [#allocation8]  }
  0x38   :  { %v65_v7 = vld [vmem:[#allocation7 + $0x38] sm:$0xff]  ;;  %v200_v8 = vpack.c.bf16 %v60_v5, %v58_v3  ;;  %v62_v10 = vld [vmem:[#allocation7 + $0x20] sm:$0xff]  ;;  %v64_v11 = vld [vmem:[#allocation7 + $0x30] sm:$0xff]  ;;  %s187_s29 = sshll.u32 %s343_s28, 4  ;;  %s188_s29 = int_to_ptr.vmem [resolvable:$true] %s187_s29 }
  0x39   :  { %v202_v9 = vpack.c.bf16 %v65_v7, %v63_v6  ;;  %v67_v12 = vld [vmem:[#allocation7 + $0x48] sm:$0xff]  ;;  %199 = vmatprep.subr.bf16.mxu0 %v198_v4  ;;  %v69_v13 = vld [vmem:[#allocation7 + $0x58] sm:$0xff]  ;;  %v204_v14 = vpack.c.bf16 %v64_v11, %v62_v10  ;;  %v66_v16 = vld [vmem:[#allocation7 + $0x40] sm:$0xff]  ;;  %s307_s30 = scalar_lea.vmem %s188_s29, 128  ;;  %p312_p11 = scmp.lt.s32.totalorder %s188_s29, %s188_s29 }
  0x3a   :  { %201 = vmatpush1.bf16.msra.mxu0 %v200_v8  ;;  %v206_v15 = vpack.c.bf16 %v69_v13, %v67_v12  ;;  %v68_v17 = vld [vmem:[#allocation7 + $0x50] sm:$0xff]  ;;  %v71_v18 = vld [vmem:[#allocation7 + $0x68] sm:$0xff]  ;;  %v73_v19 = vld [vmem:[#allocation7 + $0x78] sm:$0xff]  ;;  %p308_p10 = scmp.ne.s32.totalorder %s188_s29, %s307_s30  ;;  %p313_p12 = scmp.lt.s32.totalorder %s307_s30, %s307_s30 }
  0x3b   :  { %203 = vmatprep.subr.bf16.mxu0 %v202_v9  ;;  %v208_v20 = vpack.c.bf16 %v68_v17, %v66_v16  ;;  %v210_v21 = vpack.c.bf16 %v73_v19, %v71_v18  ;;  %v70_v22 = vld [vmem:[#allocation7 + $0x60] sm:$0xff]  ;;  %v72_v23 = vld [vmem:[#allocation7 + $0x70] sm:$0xff]  ;;  %v75_v24 = vld [vmem:[#allocation7 + $0x88] sm:$0xff] }
  0x3c   :  { %v77_v25 = vld [vmem:[#allocation7 + $0x98] sm:$0xff]  ;;  %v212_v26 = vpack.c.bf16 %v72_v23, %v70_v22  ;;  %v74_v28 = vld [vmem:[#allocation7 + $0x80] sm:$0xff]  ;;  %v76_v29 = vld [vmem:[#allocation7 + $0x90] sm:$0xff]  ;;  %p314_p13 = por %p313_p12, %p312_p11 }
  0x3d   :  { %v214_v27 = vpack.c.bf16 %v77_v25, %v75_v24  ;;  %v79_v30 = vld [vmem:[#allocation7 + $0xa8] sm:$0xff]  ;;  %v81_v31 = vld [vmem:[#allocation7 + $0xb8] sm:$0xff]  ;;  %v216_v32 = vpack.c.bf16 %v76_v29, %v74_v28  ;;  %v78_v34 = vld [vmem:[#allocation7 + $0xa0] sm:$0xff] }
  0x3e   :  { %205 = vmatpush1.bf16.msra.mxu0 %v204_v14  ;;  %v218_v33 = vpack.c.bf16 %v81_v31, %v79_v30  ;;  %v80_v35 = vld [vmem:[#allocation7 + $0xb0] sm:$0xff]  ;;  %v83_v36 = vld [vmem:[#allocation7 + $0xc8] sm:$0xff]  ;;  %v85_v37 = vld [vmem:[#allocation7 + $0xd8] sm:$0xff]  ;;  %p315_p0 = pnand %p314_p13, %p308_p10 }
  0x3f   :  { %207 = vmatprep.subr.bf16.mxu0 %v206_v15  ;;  %v220_v38 = vpack.c.bf16 %v80_v35, %v78_v34  ;;  %v222_v39 = vpack.c.bf16 %v85_v37, %v83_v36  ;;  %v82_v40 = vld [vmem:[#allocation7 + $0xc0] sm:$0xff]  ;;  %v84_v41 = vld [vmem:[#allocation7 + $0xd0] sm:$0xff]  ;;  %v87_v42 = vld [vmem:[#allocation7 + $0xe8] sm:$0xff] }
  0x40   :  { %v89_v43 = vld [vmem:[#allocation7 + $0xf8] sm:$0xff]  ;;  %v224_v44 = vpack.c.bf16 %v84_v41, %v82_v40  ;;  %v86_v46 = vld [vmem:[#allocation7 + $0xe0] sm:$0xff]  ;;  %v88_v47 = vld [vmem:[#allocation7 + $0xf0] sm:$0xff] }
  0x41   :  { %v226_v45 = vpack.c.bf16 %v89_v43, %v87_v42  ;;  %v228_v48 = vpack.c.bf16 %v88_v47, %v86_v46  ;;  %v55_v49 = vld [vmem:[#allocation2] sm:$0xff]  ;;  %v56_v50 = vld [vmem:[#allocation5] sm:$0xff] }
  0x42   :  { %209 = vmatpush1.bf16.msra.mxu0 %v208_v20  ;;  %v57_v51 = vmul.f32 %v56_v50, %v55_v49  ;;  %v197_v59 = vld [vmem:[%s425_s3] ss:$0 sm:$0xff] }
  0x43   :  { %211 = vmatprep.subr.bf16.mxu0 %v210_v21 }
  0x46   :  { %213 = vmatpush1.bf16.msra.mxu0 %v212_v26 }
  0x47   :  { %215 = vmatprep.subr.bf16.mxu0 %v214_v27 }
  0x4a   :  { %217 = vmatpush1.bf16.msra.mxu0 %v216_v32 }
  0x4b   :  { %219 = vmatprep.subr.bf16.mxu0 %v218_v33 }
  0x4e   :  { %221 = vmatpush1.bf16.msra.mxu0 %v220_v38 }
  0x4f   :  { %223 = vmatprep.subr.bf16.mxu0 %v222_v39 }
  0x52   :  { %225 = vmatpush1.bf16.msra.mxu0 %v224_v44 }
  0x53   :  { %227 = vmatprep.subr.bf16.mxu0 %v226_v45 }
  0x56   :  { %229 = vmatpush1.bf16.msra.mxu0 %v228_v48 }
  0x59   :  { %155 = vmatmul.mubr.f32.vlgmr.msra.gmra.mrb[0].mxu0 %v57_v51 }
 0x12c   :  { %v156_v52 = vpop.f32.mrb[0].mxu0 }
 0x12d   :  { %v158_v53 = vpop.f32.mrb[1].mxu0 }
 0x12e   :  { %v161_v54 = vmax.f32 %v156_v52, %v158_v53 }
 0x130   :  { %162 = vrot.lane.b32.xlu0 %v161_v54, %s341_s2 }
 0x1a2   :  { %v163_v55 = vpop.permute.xlu0 %162 }
 0x1a3   :  { %v164_v56 = vmax.f32 %v161_v54, %v163_v55 }
 0x1a5   :  { %165 = vrot.lane.b32.xlu0 %v164_v56, %s342_s25 }
 0x217   :  { %v166_v57 = vpop.permute.xlu0 %165 }
 0x218   :  { %v167_v58 = vmax.f32 %v164_v56, %v166_v57 }
 0x21a   :  { %168 = vrot.lane.b32.xlu1 %v167_v58, %s339_s18 }
 0x28c   :  { %v169_v60 = vpop.permute.xlu1 %168 }
 0x28d   :  { %v170_v61 = vmax.f32 %v167_v58, %v169_v60 }
 0x28f   :  { %v178_v62 = vadd.f32 %v197_v59, %v170_v61 }
 0x291   :  { %239 = vtanh.f32 %v178_v62 }
 0x29b   :  { %v240_v63 = vpop.eup %239 }
 0x29c   :  { %180 = vst [vmem:[#allocation8] sm:$0xff] %v240_v63 }
 0x29d   :  { %318 = shalt.err (!%p315_p0)
}
 0x29e   :  { %s319_s3 = scalar_lea.hbm %s426_s4, 128 }
 0x29f   :  { %p320_p1 = scmp.ne.s32.totalorder %s426_s4, %s319_s3  ;;  %p323_p2 = scmp.lt.u32.totalorder %s319_s3, %s426_s4 }
 0x2a1   :  { %p325_p3 = pnand %p323_p2, %p320_p1 }
 0x2a3   :  { %328 = shalt.err (!%p325_p3)
}
 0x2a4   :  { %190 = dma.vmem_to_hbm [thread:$0]  %s188_s29, 128, %s426_s4, [#allocation4]  }
 0x2a5   :  { %333 = dma.done.wait [#allocation4], 128  }
 0x2a6   :  { %334 = vsyncadd [#allocation4], 4294967168 }
 0x2a7   :  { %194 = vsyncpa [#allocation3], 1 }
 0x2a8   :  { %195 = vsyncpa [#allocation6], 1 }
 0x2a9   :  { %196 = vsyncpa [#allocation4], 1 }

</bundles_post_ra>
